<compile_context>
chip_gen: v7x
topology: tpu7x:2x2x1
jax: 0.10.0
libtpu: 0.0.40
codegen_flags: <defaults>
</compile_context>

<pallas_src>
import functools
import math

import jax
import jax.numpy as jnp
import numpy as np
from jax.experimental import pallas as pl
from jax.experimental.pallas import tpu as pltpu


# ----------------------------------------------------------------------------
# Glue: per-channel bilinear translation.  Equivalent to torch's
# affine_grid + grid_sample (bilinear, zeros padding, align_corners=False):
# output(i, j) samples input at (i + dy, j + dx).  shifts[c] = (dx_px, dy_px).
# TODO(synk): one-off cross-check against torch.nn.functional.grid_sample to
# pin down the translation sign/normalization convention beyond this JAX ref.
# ----------------------------------------------------------------------------
def randomshift_jax(x_cnhw, shifts):
    C, N, H, W = x_cnhw.shape

    def shift_one(xc, dxy):  # xc: (N, H, W)
        dx, dy = dxy[0], dxy[1]
        jj = jnp.arange(W, dtype=jnp.float32) + dx  # sample column coordinates
        ii = jnp.arange(H, dtype=jnp.float32) + dy  # sample row coordinates
        j0f = jnp.floor(jj)
        i0f = jnp.floor(ii)
        wj1 = (jj - j0f).astype(xc.dtype)
        wj0 = 1.0 - wj1
        wi1 = (ii - i0f).astype(xc.dtype)
        wi0 = 1.0 - wi1
        j0 = j0f.astype(jnp.int32)
        i0 = i0f.astype(jnp.int32)

        def gather_cols(j):
            valid = ((j >= 0) & (j < W)).astype(xc.dtype)
            return xc[:, :, jnp.clip(j, 0, W - 1)] * valid[None, None, :]

        xw = gather_cols(j0) * wj0[None, None, :] + gather_cols(j0 + 1) * wj1[None, None, :]

        def gather_rows(i):
            valid = ((i >= 0) & (i < H)).astype(xc.dtype)
            return xw[:, jnp.clip(i, 0, H - 1), :] * valid[None, :, None]

        return gather_rows(i0) * wi0[None, :, None] + gather_rows(i0 + 1) * wi1[None, :, None]

    return jax.vmap(shift_one)(x_cnhw, shifts)


# ----------------------------------------------------------------------------
# Helpers
# ----------------------------------------------------------------------------
def _round_up(x, m):
    return ((x + m - 1) // m) * m


def _tpu_generation_info():
    """Return (num_tensorcores_per_device, vmem_limit_headroom_bytes)."""
    vmem_cap = None
    try:
        vmem_cap = int(pltpu.get_tpu_info().vmem_capacity_bytes)
    except Exception:
        vmem_cap = None
    kind = ""
    try:
        kind = jax.devices()[0].device_kind.lower()
    except Exception:
        pass
    two_tc = any(t in kind for t in ("v7", "v4", "v5p"))
    if vmem_cap is None:
        vmem_cap = (64 if two_tc else 128) * 1024 * 1024
    # leave ~25% headroom for compiler-internal scratch (critical on v7x 64 MiB)
    return (2 if two_tc else 1), int(vmem_cap * 3 // 4)


def _pick_tile_cols(m_cols, tm_req, num_tc):
    """Largest 128-aligned M tile <= tm_req.  Only split small problems into
    multiple tiles when the chip actually has >1 TensorCore (v7x / megacore);
    on single-TC v5e/v6e the grid is a serial loop so splitting only adds
    per-step overhead."""
    tm_req = max(128, (tm_req // 128) * 128)
    tm = min(tm_req, _round_up(m_cols, 128))
    if num_tc > 1:
        per_tc = _round_up((m_cols + num_tc - 1) // num_tc, 128)
        tm = min(tm, max(128, per_tc))
    return max(128, tm)


# ----------------------------------------------------------------------------
# Pallas kernel (transposed formulation):
#   o^T(out_c, tm) = W^T(out_c, K) @ [x; x^2; ...; x^q]^T(K, tm) + bias
# Power blocks are (F_pad8, tm) slabs concatenated along sublanes at 8-aligned
# offsets (no relayout); the weight arrives pre-packed / pre-cast host-side so
# there is no per-step weight recast in the kernel.
# ----------------------------------------------------------------------------
def _superonn_matmul_kernel(p_ref, w_ref, b_ref, o_ref, *, q, mxu_dtype):
    x1 = p_ref[...].astype(jnp.float32)              # (F_pad8, tm), 128-lane dense
    powers = [x1]
    xp = x1
    for _ in range(q - 1):                           # static unroll (VPU, f32)
        xp = xp * x1
        powers.append(xp)
    xq = powers[0] if q == 1 else jnp.concatenate(powers, axis=0)   # (K, tm)
    acc = jnp.dot(w_ref[...], xq.astype(mxu_dtype),
                  preferred_element_type=jnp.float32)               # (out_c, tm)
    o_ref[...] = (acc + b_ref[...]).astype(o_ref.dtype)


def superonn_pallas_matmul(patches_t, w_t, bias_col, q, tm, *, mxu_dtype,
                           vmem_headroom, cost_estimate):
    F_pad8, Mp = patches_t.shape
    out_c_pad8, K = w_t.shape
    kern = functools.partial(_superonn_matmul_kernel, q=q, mxu_dtype=mxu_dtype)

    psz = patches_t.dtype.itemsize
    wsz = w_t.dtype.itemsize
    # VMEM budget: double-buffered patch/output tiles, resident weight+bias
    # (pallas still allocates 2 buffers for constant-index specs), plus the
    # in-kernel temporaries (q power slabs, the concatenated xq, its mxu-dtype
    # cast, and the f32 accumulator) -- these WERE uncounted before.
    need = (2 * F_pad8 * tm * psz
            + 2 * out_c_pad8 * tm * 4
            + 2 * (out_c_pad8 * K * wsz + out_c_pad8 * 4)
            + 4 * tm * (q * F_pad8 + K)         # power slabs + concat (f32)
            + wsz * tm * K                       # xq cast to mxu dtype
            + 4 * out_c_pad8 * tm)               # f32 accumulator
    vmem_limit = int(min(vmem_headroom, max(2 * need, 16 * 1024 * 1024)))

    # TODO(synk): for very large q*C*kH*kW the resident weight no longer fits;
    # add a K grid axis ("arbitrary") with a VMEM accumulator and stream
    # (tk, out_c) weight tiles instead.
    return pl.pallas_call(
        kern,
        out_shape=jax.ShapeDtypeStruct((out_c_pad8, Mp), jnp.float32),
        grid_spec=pltpu.PrefetchScalarGridSpec(
            num_scalar_prefetch=0,
            grid=(Mp // tm,),
            in_specs=[
                pl.BlockSpec((F_pad8, tm), lambda i: (0, i)),        # patch tile
                pl.BlockSpec((out_c_pad8, K), lambda i: (0, 0)),     # resident W^T
                pl.BlockSpec((out_c_pad8, 1), lambda i: (0, 0)),     # resident bias
            ],
            out_specs=pl.BlockSpec((out_c_pad8, tm), lambda i: (0, i)),  # lane-dense
        ),
        compiler_params=pltpu.CompilerParams(
            dimension_semantics=("parallel",),
            vmem_limit_bytes=vmem_limit,
        ),
        cost_estimate=cost_estimate,
    )(patches_t, w_t, bias_col)


# ----------------------------------------------------------------------------
# Full SuperONN2d forward (stride=1, as in the PyTorch module).
# ----------------------------------------------------------------------------
def superonn2d_forward(x, weights, bias, shifts, q, padding, dilation,
                       tm=None, mxu_dtype=jnp.bfloat16):
    N, C, H, W = x.shape
    out_c, _, kH, kW = weights.shape
    pH, pW = padding
    dH, dW = dilation

    num_tc, vmem_headroom = _tpu_generation_info()

    # per-channel shift (permute to CNHW, shift, permute back) -- JAX glue
    xs = randomshift_jax(jnp.transpose(x, (1, 0, 2, 3)), shifts)
    xs = jnp.transpose(xs, (1, 0, 2, 3))

    # TODO(synk): nn.Dropout2d not implemented (module default dropout=None).

    # Transposed im2col: rows are features in (c, kH, kW) order, columns are
    # output positions (n, oh, ow).
    # TODO(synk): im2col stays on the XLA side; fusing it into the kernel needs
    # manual halo DMA over the spatial dims and is left as a follow-up.
    OH = H + 2 * pH - dH * (kH - 1)
    OW = W + 2 * pW - dW * (kW - 1)
    xpad = jnp.pad(xs, ((0, 0), (0, 0), (pH, pH), (pW, pW)))
    cols = [xpad[:, :, ki * dH:ki * dH + OH, kj * dW:kj * dW + OW]
            for ki in range(kH) for kj in range(kW)]
    pt = jnp.stack(cols, axis=0)                 # (kHkW, N, C, OH, OW)
    pt = pt.transpose(2, 0, 1, 3, 4)             # (C, kHkW, N, OH, OW)
    F = C * kH * kW
    M = N * OH * OW
    patches_t = pt.reshape(F, M)                 # (F, M)

    # tiling / padding choices
    F_pad8 = _round_up(F, 8)                     # sublane-aligned power blocks
    out_c_pad8 = _round_up(out_c, 8)             # sublane-aligned output rows
    K = q * F_pad8                               # dense-packed contraction dim
    tm_req = tm if tm is not None else (1024 if vmem_headroom >= 72 * 2 ** 20 else 512)
    tm_eff = _pick_tile_cols(M, tm_req, num_tc)
    Mp = _round_up(M, tm_eff)

    use_bf16 = np.dtype(mxu_dtype) == np.dtype(jnp.bfloat16)
    patch_dtype = jnp.bfloat16 if use_bf16 else jnp.float32
    patches_t = jnp.pad(patches_t, ((0, F_pad8 - F), (0, Mp - M))).astype(patch_dtype)

    # weights (out, q*C, kH, kW) -> W^T (out_c_pad8, q*F_pad8), q-major dense
    # rows matching the kernel's power-block layout; pre-cast to the MXU dtype.
    w = weights.reshape(out_c, q, C, kH, kW).reshape(out_c, q, F)
    w = jnp.pad(w, ((0, out_c_pad8 - out_c), (0, 0), (0, F_pad8 - F)))
    w_t = w.reshape(out_c_pad8, K).astype(mxu_dtype)
    b_col = jnp.pad(bias.reshape(out_c, 1),
                    ((0, out_c_pad8 - out_c), (0, 0))).astype(jnp.float32)

    cost = pl.CostEstimate(
        flops=int(2 * Mp * K * out_c_pad8 + (q - 1) * Mp * F_pad8),
        transcendentals=0,
        bytes_accessed=int(Mp * F_pad8 * patches_t.dtype.itemsize
                           + out_c_pad8 * K * w_t.dtype.itemsize
                           + out_c_pad8 * 4
                           + out_c_pad8 * Mp * 4),
    )

    out_t = superonn_pallas_matmul(patches_t, w_t, b_col, q, tm_eff,
                                   mxu_dtype=mxu_dtype,
                                   vmem_headroom=vmem_headroom,
                                   cost_estimate=cost)
    # (out_c, M) -> NCHW (module contract); only out_c*M*4 bytes to reshuffle.
    out = out_t[:out_c, :M].reshape(out_c, N, OH, OW).transpose(1, 0, 2, 3)
    return out


# ----------------------------------------------------------------------------
# Pure-JAX references (mirror the PyTorch forward) for validation.
# ----------------------------------------------------------------------------
def reference_forward(x, weights, bias, shifts, q, padding, dilation):
    xs = randomshift_jax(jnp.transpose(x, (1, 0, 2, 3)), shifts)
    xs = jnp.transpose(xs, (1, 0, 2, 3))
    xcat = jnp.concatenate([xs ** i for i in range(1, q + 1)], axis=1)
    out = jax.lax.conv_general_dilated(
        xcat, weights, window_strides=(1, 1),
        padding=[(padding[0], padding[0]), (padding[1], padding[1])],
        rhs_dilation=dilation,
        dimension_numbers=("NCHW", "OIHW", "NCHW"),
        precision=jax.lax.Precision.HIGHEST,
    )
    return out + bias[None, :, None, None]


def reference_forward_quantized(x, weights, bias, shifts, q, padding, dilation,
                                qdtype=jnp.bfloat16):
    """Reference with the same bf16 operand quantization the kernel applies
    (bf16 patches, f32 power expansion, bf16 dot operands, f32 accumulation),
    so the comparison isolates summation-order differences only."""
    xs = randomshift_jax(jnp.transpose(x, (1, 0, 2, 3)), shifts)
    xs = jnp.transpose(xs, (1, 0, 2, 3))
    xsq = xs.astype(qdtype).astype(jnp.float32)
    pows = []
    xp = xsq
    for i in range(q):
        if i > 0:
            xp = xp * xsq
        pows.append(xp.astype(qdtype).astype(jnp.float32))
    xcat = jnp.concatenate(pows, axis=1)
    wq = weights.astype(qdtype).astype(jnp.float32)
    out = jax.lax.conv_general_dilated(
        xcat, wq, window_strides=(1, 1),
        padding=[(padding[0], padding[0]), (padding[1], padding[1])],
        rhs_dilation=dilation,
        dimension_numbers=("NCHW", "OIHW", "NCHW"),
        precision=jax.lax.Precision.HIGHEST,
    )
    return out + bias[None, :, None, None]


if __name__ == "__main__":
    # module config
    N, C_in, H, W = 2, 4, 16, 16
    out_c, ksize, q = 8, 3, 3
    padding = (1, 1)
    dilation = (1, 1)
    max_shift = 1.5          # non-zero so randomshift actually does something
    kH = kW = ksize

    # deterministic parameter init (matches reset_parameters semantics)
    key = jax.random.PRNGKey(0)
    k1, k2, k3, k4 = jax.random.split(key, 4)
    gain = 5.0 / 3.0                                   # calculate_gain('tanh')
    fan_in = q * C_in * kH * kW
    fan_out = out_c * kH * kW
    bw = gain * math.sqrt(6.0 / (fan_in + fan_out))    # xavier_uniform bound
    weights = jax.random.uniform(k1, (out_c, q * C_in, kH, kW),
                                 minval=-bw, maxval=bw, dtype=jnp.float32)
    bb = 1.0 / math.sqrt(fan_in)
    bias = jax.random.uniform(k2, (out_c,), minval=-bb, maxval=bb, dtype=jnp.float32)
    shifts = jax.random.uniform(k3, (C_in, 2), minval=-max_shift, maxval=max_shift,
                                dtype=jnp.float32)
    x = jax.random.normal(k4, (N, C_in, H, W), dtype=jnp.float32)

    # default path: bf16 MXU operands (pre-cast host-side), f32 accumulation
    out = superonn2d_forward(x, weights, bias, shifts, q, padding, dilation)
    out = jax.block_until_ready(out)

    # tight numerical check against a reference with identical bf16 operand
    # quantization (differences = summation order only)
    ref_q = reference_forward_quantized(x, weights, bias, shifts, q, padding, dilation)
    np.testing.assert_allclose(np.asarray(out), np.asarray(ref_q), rtol=2e-3, atol=2e-3)

    # loose semantic sanity check against the full-precision f32 reference
    # (bounds the bf16 quantization error; catches any layout/ordering bug)
    ref = reference_forward(x, weights, bias, shifts, q, padding, dilation)
    np.testing.assert_allclose(np.asarray(out), np.asarray(ref), rtol=1e-1, atol=2.5e-1)

    print("KERNEL_OK")
</pallas_src>

<mosaic_0001>
module attributes {stable_mosaic.version = 11 : i64} {
  func.func @_superonn_matmul_kernel(%arg0: i32, %arg1: memref<40x512xbf16, #tpu.memory_space<vmem>>, %arg2: memref<8x120xbf16, #tpu.memory_space<vmem>>, %arg3: memref<8x1xf32, #tpu.memory_space<vmem>>, %arg4: memref<8x512xf32, #tpu.memory_space<vmem>>) attributes {dimension_semantics = [#tpu.dimension_semantics<parallel>], iteration_bounds = array<i64: 1>, scalar_prefetch = 0 : i64, scratch_operands = 0 : i64, tpu.core_type = #tpu.core_type<tc>, window_params = [{transform_indices = @transform_0, window_bounds = array<i64: 40, 512>}, {pipeline_mode = #tpu.pipeline_mode<synchronous>, transform_indices = @transform_1, window_bounds = array<i64: 8, 120>}, {pipeline_mode = #tpu.pipeline_mode<synchronous>, transform_indices = @transform_2, window_bounds = array<i64: 8, 1>}, {transform_indices = @transform_3, window_bounds = array<i64: 8, 512>}]} {
    %c0 = arith.constant 0 : index
    %c0_0 = arith.constant 0 : index
    %0 = vector.load %arg1[%c0, %c0_0] : memref<40x512xbf16, #tpu.memory_space<vmem>>, vector<40x512xbf16>
    %1 = arith.extf %0 : vector<40x512xbf16> to vector<40x512xf32>
    %2 = arith.mulf %1, %1 : vector<40x512xf32>
    %3 = arith.mulf %2, %1 : vector<40x512xf32>
    %4 = tpu.concatenate %1, %2, %3 in 0 : vector<40x512xf32>, vector<40x512xf32>, vector<40x512xf32> -> vector<120x512xf32>
    %c0_1 = arith.constant 0 : index
    %c0_2 = arith.constant 0 : index
    %5 = vector.load %arg2[%c0_1, %c0_2] : memref<8x120xbf16, #tpu.memory_space<vmem>>, vector<8x120xbf16>
    %6 = arith.truncf %4 : vector<120x512xf32> to vector<120x512xbf16>
    %cst = arith.constant dense<0.000000e+00> : vector<8x512xf32>
    %7 = tpu.matmul %5, %6, %cst {dimension_numbers = #tpu.dot_dimension_numbers<[1], [0], [0], [1], [0, 0, 1, 1], [], []>} : vector<8x120xbf16>, vector<120x512xbf16>, vector<8x512xf32> -> vector<8x512xf32>
    %c0_3 = arith.constant 0 : index
    %c0_4 = arith.constant 0 : index
    %8 = vector.load %arg3[%c0_3, %c0_4] : memref<8x1xf32, #tpu.memory_space<vmem>>, vector<8x1xf32>
    %9 = vector.broadcast %8 : vector<8x1xf32> to vector<8x512xf32>
    %10 = arith.addf %7, %9 : vector<8x512xf32>
    %c0_5 = arith.constant 0 : index
    %c0_6 = arith.constant 0 : index
    %11 = vector.load %arg4[%c0_5, %c0_6] : memref<8x512xf32, #tpu.memory_space<vmem>>, vector<8x512xf32>
    tpu.vector_store %arg4[%c0_5, %c0_6], %10 {strides = array<i32>} : memref<8x512xf32, #tpu.memory_space<vmem>>, vector<8x512xf32>,
    return
  }
  func.func @transform_0(%arg0: i32) -> (i32, i32) {
    %c0_i32 = arith.constant 0 : i32
    %c0_i32_0 = arith.constant 0 : i32
    return %c0_i32, %arg0 : i32, i32
  }
  func.func @transform_1(%arg0: i32) -> (i32, i32) {
    %c0_i32 = arith.constant 0 : i32
    %c0_i32_0 = arith.constant 0 : i32
    %c0_i32_1 = arith.constant 0 : i32
    return %c0_i32, %c0_i32_0 : i32, i32
  }
  func.func @transform_2(%arg0: i32) -> (i32, i32) {
    %c0_i32 = arith.constant 0 : i32
    %c0_i32_0 = arith.constant 0 : i32
    %c0_i32_1 = arith.constant 0 : i32
    return %c0_i32, %c0_i32_0 : i32, i32
  }
  func.func @transform_3(%arg0: i32) -> (i32, i32) {
    %c0_i32 = arith.constant 0 : i32
    %c0_i32_0 = arith.constant 0 : i32
    return %c0_i32, %arg0 : i32, i32
  }
}

</mosaic_0001>

<bundles_post_ra>
// kernel: tpu_custom_call.1
= control target key start
LH: loop header
LB: loop body
LE: loop exit
PB: predicated region body
PF: predicated region fallthrough
CT: control target
= control target key end

     0   :  { %8 = vsyncpa [#allocation3], 0  ;;  %s431_s0 = inlined_call_operand.hbm [shape: bf16[40,512], index: 0, kind: input, shape index: {}]   ;;  %s432_s1 = inlined_call_operand.vmem [shape: bf16[8,120], index: 1, kind: input, shape index: {}]   ;;  %s433_s2 = inlined_call_operand.vmem [shape: f32[8,1], index: 2, kind: input, shape index: {}]   ;;  %s434_s3 = inlined_call_operand.hbm [shape: f32[8,512], index: 3, kind: output, shape index: {}]  }
   0x1   :  { %9 = vsyncpa [#allocation4], 0  ;;  %s331_s12 = smov [#allocation2]   ;;  %s283_s16 = scalar_lea.hbm %s431_s0, 1280 }
   0x2   :  { %s15_s13 = sshll.u32 %s331_s12, 4  ;;  %p284_p0 = scmp.ne.s32.totalorder %s431_s0, %s283_s16  ;;  %s16_s13 = int_to_ptr.vmem [resolvable:$true] %s15_s13 }
   0x3   :  { %p287_p1 = scmp.lt.u32.totalorder %s283_s16, %s431_s0 }
   0x5   :  { %p289_p2 = pnand %p287_p1, %p284_p0 }
   0x7   :  { %292 = shalt.err (!%p289_p2)
}
   0x8   :  { %s293_s21 = scalar_lea.vmem %s16_s13, 1280  ;;  %p298_p4 = scmp.lt.s32.totalorder %s16_s13, %s16_s13 }
   0x9   :  { %p294_p3 = scmp.ne.s32.totalorder %s16_s13, %s293_s21  ;;  %p299_p5 = scmp.lt.s32.totalorder %s293_s21, %s293_s21 }
   0xb   :  { %p300_p6 = por %p299_p5, %p298_p4 }
   0xd   :  { %p301_p7 = pnand %p300_p6, %p294_p3 }
   0xf   :  { %304 = shalt.err (!%p301_p7)
}
  0x10   :  { %s332_s22 = smov 256   ;;  %s333_s23 = smov 16  }
  0x11   :  { %21 = dma.hbm_to_vmem [thread:$0]  %s431_s0, 1280, %s16_s13, [#allocation3], %s332_s22, %s332_s22, %s333_s23  }
  0x12   :  { %327 = dma.done.wait [#allocation3], 1280  }
  0x13   :  { %328 = vsyncadd [#allocation3], 4294966016  ;;  %v334_v0 = vmov 0   ;;  %v30_v1 = vld [vmem:[#allocation2] sm:$0xff]  ;;  %v32_v2 = vld [vmem:[#allocation2 + $0x10] sm:$0xff]  ;;  %vm143_vm0 = vcmask 1043456  }
  0x14   :  { %188 = vmatprep.mubr.bf16.mxu0 %v334_v0  ;;  %229 = vmatprep.mubr.bf16.mxu1 %v334_v0  ;;  %v31_v3 = vld [vmem:[#allocation2 + $0x8] sm:$0xff]  ;;  %v258_v4 = vcombine.high %v30_v1, %v32_v2  ;;  %v33_v5 = vld [vmem:[#allocation2 + $0x18] sm:$0xff]  ;;  %v257_v6 = vcombine.low %v30_v1, %v32_v2  ;;  %v34_v7 = vld [vmem:[#allocation2 + $0x20] sm:$0xff]  ;;  %v370_v9 = vunpack.c.h.bf16 %v30_v1  ;;  %v40_v26 = vunpack.c.l.bf16 %v30_v1  ;;  %s335_s28 = smov [#allocation5]  }
  0x15   :  { %274 = vset.pattern.permute.xlu0 %v334_v0  ;;  %v368_v8 = vld [vmem:[#allocation2 + $0x30] sm:$0xff]  ;;  %v372_v10 = vunpack.c.h.bf16 %v31_v3  ;;  %v260_v11 = vcombine.high %v31_v3, %v33_v5  ;;  %v259_v12 = vcombine.low %v31_v3, %v33_v5  ;;  %v35_v14 = vld [vmem:[#allocation2 + $0x28] sm:$0xff]  ;;  %v37_v15 = vld [vmem:[#allocation2 + $0x38] sm:$0xff]  ;;  %v390_v29 = vunpack.c.l.bf16 %v31_v3  ;;  %s248_s29 = sshll.u32 %s335_s28, 4  ;;  %s249_s29 = int_to_ptr.vmem [resolvable:$true] %s248_s29 }
  0x16   :  { %v262_v13 = vcombine.high %v34_v7, %v368_v8  ;;  %v261_v16 = vcombine.low %v34_v7, %v368_v8  ;;  %v38_v17 = vld [vmem:[#allocation2 + $0x40] sm:$0xff]  ;;  %156 = vmatprep.subr.bf16.mxu0 %v258_v4  ;;  %v264_v18 = vcombine.high %v35_v14, %v37_v15  ;;  %v263_v19 = vcombine.low %v35_v14, %v37_v15  ;;  %v39_v22 = vld [vmem:[#allocation2 + $0x48] sm:$0xff]  ;;  %p310_p9 = scmp.lt.s32.totalorder %s249_s29, %s249_s29 }
  0x17   :  { %v376_v20 = vunpack.c.h.bf16 %v38_v17  ;;  %v61_v21 = vmul.f32 %v370_v9, %v370_v9  ;;  %v133_v23 = vld [vmem:[%s433_s2] sm:$0xff]  ;;  %197 = vmatprep.subr.bf16.mxu1 %v260_v11  ;;  %157 = vmatpush1.bf16.msra.mxu0 %v257_v6  ;;  %v383_v24 = vunpack.c.h.bf16 %v39_v22  ;;  %v63_v25 = vmul.f32 %v372_v10, %v372_v10 }
  0x18   :  { %v387_v27 = vunpack.c.l.bf16 %v38_v17  ;;  %198 = vmatpush1.bf16.msra.mxu1 %v259_v12  ;;  %158 = vmatprep.subr.bf16.mxu0 %v262_v13  ;;  %v392_v30 = vunpack.c.l.bf16 %v39_v22  ;;  %v45_v31 = vunpack.c.h.bf16 %v32_v2  ;;  %v60_v33 = vmul.f32 %v40_v26, %v40_v26 }
  0x19   :  { %v110_v28 = vpack.c.bf16 %v61_v21, %v376_v20  ;;  %199 = vmatprep.subr.bf16.mxu1 %v264_v18  ;;  %v112_v32 = vpack.c.bf16 %v63_v25, %v383_v24  ;;  %v49_v34 = vunpack.c.h.bf16 %v34_v7  ;;  %v47_v35 = vunpack.c.h.bf16 %v33_v5  ;;  %136 = vperm.xlu0 %274, %v133_v23  }
  0x1a   :  { %v62_v36 = vmul.f32 %v390_v29, %v390_v29  ;;  %v65_v37 = vmul.f32 %v45_v31, %v45_v31  ;;  %v51_v38 = vunpack.c.h.bf16 %v35_v14  ;;  %v44_v39 = vunpack.c.l.bf16 %v32_v2 }
  0x1b   :  { %159 = vmatpush1.bf16.msra.mxu0 %v261_v16  ;;  %v109_v40 = vpack.c.bf16 %v60_v33, %v387_v27  ;;  %v69_v41 = vmul.f32 %v49_v34, %v49_v34  ;;  %v67_v42 = vmul.f32 %v47_v35, %v47_v35  ;;  %v48_v43 = vunpack.c.l.bf16 %v34_v7 }
  0x1c   :  { %200 = vmatpush1.bf16.msra.mxu1 %v263_v19  ;;  %160 = vmatprep.subr.bf16.mxu0 %v110_v28  ;;  %v111_v44 = vpack.c.bf16 %v62_v36, %v392_v30  ;;  %v71_v45 = vmul.f32 %v51_v38, %v51_v38  ;;  %v64_v46 = vmul.f32 %v44_v39, %v44_v39  ;;  %v46_v47 = vunpack.c.l.bf16 %v33_v5 }
  0x1d   :  { %201 = vmatprep.subr.bf16.mxu1 %v112_v32  ;;  %v114_v48 = vpack.c.bf16 %v69_v41, %v65_v37  ;;  %v68_v49 = vmul.f32 %v48_v43, %v48_v43  ;;  %v50_v50 = vunpack.c.l.bf16 %v35_v14  ;;  %v53_v51 = vunpack.c.h.bf16 %v368_v8 }
  0x1e   :  { %v116_v52 = vpack.c.bf16 %v71_v45, %v67_v42  ;;  %v66_v53 = vmul.f32 %v46_v47, %v46_v47  ;;  %v77_v54 = vmul.f32 %v376_v20, %v376_v20  ;;  %v55_v55 = vunpack.c.h.bf16 %v37_v15 }
  0x1f   :  { %161 = vmatpush1.bf16.msra.mxu0 %v109_v40  ;;  %v113_v56 = vpack.c.bf16 %v68_v49, %v64_v46  ;;  %v70_v57 = vmul.f32 %v50_v50, %v50_v50  ;;  %v73_v58 = vmul.f32 %v53_v51, %v53_v51  ;;  %v79_v59 = vmul.f32 %v383_v24, %v383_v24 }
  0x20   :  { %202 = vmatpush1.bf16.msra.mxu1 %v111_v44  ;;  %162 = vmatprep.subr.bf16.mxu0 %v114_v48  ;;  %v75_v60 = vmul.f32 %v55_v55, %v55_v55  ;;  %v52_v61 = vunpack.c.l.bf16 %v368_v8  ;;  %v76_v62 = vmul.f32 %v387_v27, %v387_v27  ;;  %v54_v63 = vunpack.c.l.bf16 %v37_v15 }
  0x21   :  { %203 = vmatprep.subr.bf16.mxu1 %v116_v52  ;;  %v115_v0 = vpack.c.bf16 %v70_v57, %v66_v53  ;;  %v118_v1 = vpack.c.bf16 %v77_v54, %v73_v58  ;;  %v78_v2 = vmul.f32 %v392_v30, %v392_v30  ;;  %v81_v3 = vmul.f32 %v61_v21, %v370_v9 }
  0x22   :  { %v120_v4 = vpack.c.bf16 %v79_v59, %v75_v60  ;;  %v72_v5 = vmul.f32 %v52_v61, %v52_v61  ;;  %v74_v6 = vmul.f32 %v54_v63, %v54_v63  ;;  %v85_v7 = vmul.f32 %v65_v37, %v45_v31 }
  0x23   :  { %163 = vmatpush1.bf16.msra.mxu0 %v113_v56  ;;  %v83_v11 = vmul.f32 %v63_v25, %v372_v10  ;;  %v87_v8 = vmul.f32 %v67_v42, %v47_v35  ;;  %v80_v12 = vmul.f32 %v60_v33, %v40_v26  ;;  %v84_v13 = vmul.f32 %v64_v46, %v44_v39 }
  0x24   :  { %204 = vmatpush1.bf16.msra.mxu1 %v115_v0  ;;  %164 = vmatprep.subr.bf16.mxu0 %v118_v1  ;;  %v117_v14 = vpack.c.bf16 %v76_v62, %v72_v5  ;;  %v119_v15 = vpack.c.bf16 %v78_v2, %v74_v6  ;;  %v122_v16 = vpack.c.bf16 %v85_v7, %v81_v3  ;;  %vm139_vm1 = vcmask 982016  }
  0x25   :  { %205 = vmatprep.subr.bf16.mxu1 %v120_v4  ;;  %v124_v17 = vpack.c.bf16 %v87_v8, %v83_v11  ;;  %v82_v18 = vmul.f32 %v62_v36, %v390_v29  ;;  %v86_v9 = vmul.f32 %v66_v53, %v46_v47  ;;  %v89_v19 = vmul.f32 %v69_v41, %v49_v34 }
  0x26   :  { %v93_v21 = vmul.f32 %v73_v58, %v53_v51  ;;  %v91_v22 = vmul.f32 %v71_v45, %v51_v38  ;;  %v95_v23 = vmul.f32 %v75_v60, %v55_v55  ;;  %v121_v28 = vpack.c.bf16 %v84_v13, %v80_v12 }
  0x27   :  { %165 = vmatpush1.bf16.msra.mxu0 %v117_v14  ;;  %v123_v10 = vpack.c.bf16 %v86_v9, %v82_v18  ;;  %v88_v25 = vmul.f32 %v68_v49, %v48_v43  ;;  %v92_v26 = vmul.f32 %v72_v5, %v52_v61  ;;  %v90_v32 = vmul.f32 %v70_v57, %v50_v50 }
  0x28   :  { %206 = vmatpush1.bf16.msra.mxu1 %v119_v15  ;;  %166 = vmatprep.subr.bf16.mxu0 %v122_v16  ;;  %v126_v31 = vpack.c.bf16 %v93_v21, %v89_v19  ;;  %v94_v33 = vmul.f32 %v74_v6, %v54_v63  ;;  %v128_v35 = vpack.c.bf16 %v95_v23, %v91_v22 }
  0x29   :  { %207 = vmatprep.subr.bf16.mxu1 %v124_v17  ;;  %v97_v37 = vmul.f32 %v77_v54, %v376_v20  ;;  %v99_v29 = vmul.f32 %v79_v59, %v383_v24  ;;  %v96_v34 = vmul.f32 %v76_v62, %v387_v27  ;;  %v98_v36 = vmul.f32 %v78_v2, %v392_v30  ;;  %v100_v27 = vld [vmem:[%s432_s1] sm:$0xf]  ;;  %s305_s1 = scalar_lea.vmem %s249_s29, 512 }
  0x2a   :  { %v125_v38 = vpack.c.bf16 %v92_v26, %v88_v25  ;;  %v127_v39 = vpack.c.bf16 %v94_v33, %v90_v32  ;;  %p306_p8 = scmp.ne.s32.totalorder %s249_s29, %s305_s1  ;;  %p311_p10 = scmp.lt.s32.totalorder %s305_s1, %s305_s1 }
  0x2b   :  { %167 = vmatpush1.bf16.msra.mxu0 %v121_v28  ;;  %v130_v40 = vpack.c.bf16 %v97_v37, %v97_v37  ;;  %v129_v41 = vpack.c.bf16 %v96_v34, %v96_v34  ;;  %v132_v42 = vpack.c.bf16 %v99_v29, %v99_v29  ;;  %v131_v43 = vpack.c.bf16 %v98_v36, %v98_v36 }
  0x2c   :  { %208 = vmatpush1.bf16.msra.mxu1 %v123_v10  ;;  %168 = vmatprep.subr.bf16.mxu0 %v126_v31  ;;  %p312_p11 = por %p311_p10, %p310_p9 }
  0x2d   :  { %209 = vmatprep.subr.bf16.mxu1 %v128_v35  ;;  %v145_v20 = vsel %vm143_vm0, %v129_v41, 0  ;;  %v151_v24 = vsel %vm143_vm0, %v131_v43, 0 }
  0x2e   :  { %p313_p12 = pnand %p312_p11, %p306_p8 }
  0x2f   :  { %169 = vmatpush1.bf16.msra.mxu0 %v125_v38 }
  0x30   :  { %210 = vmatpush1.bf16.msra.mxu1 %v127_v39  ;;  %265 = vmatprep.subr.msk.bf16.mxu0 %vm143_vm0, %v130_v40 }
  0x31   :  { %267 = vmatprep.subr.msk.bf16.mxu1 %vm143_vm0, %v132_v42 }
  0x33   :  { %171 = vmatpush1.bf16.msra.mxu0 %v145_v20 }
  0x34   :  { %212 = vmatpush1.bf16.msra.mxu1 %v151_v24 }
  0x36   :  { %266 = vmatmul.mubr.msk.bf16.vlgmr.msra.gmra.mrb[0].mxu0 %vm139_vm1, %v100_v27 }
  0x37   :  { %268 = vmatmul.mubr.msk.bf16.vlgmr.msra.gmra.mrb[0].mxu1 %vm139_vm1, %v100_v27 }
  0x98   :  { %v137_v30 = vpop.permute.xlu0 %136 }
 0x109   :  { %v190_v44 = vpop.f32.mrb[0].mxu0 }
 0x10a   :  { %v191_v45 = vadd.f32 %v190_v44, %v137_v30  ;;  %v231_v46 = vpop.f32.mrb[0].mxu1  ;;  %v192_v47 = vpop.f32.mrb[1].mxu0 }
 0x10b   :  { %v232_v48 = vadd.f32 %v231_v46, %v137_v30  ;;  %v193_v49 = vadd.f32 %v192_v47, %v137_v30  ;;  %v233_v50 = vpop.f32.mrb[1].mxu1  ;;  %v194_v51 = vpop.f32.mrb[2].mxu0 }
 0x10c   :  { %238 = vst [vmem:[#allocation5] sm:$0xff] %v191_v45  ;;  %v234_v52 = vadd.f32 %v233_v50, %v137_v30  ;;  %v235_v53 = vpop.f32.mrb[2].mxu1  ;;  %v195_v54 = vpop.f32.mrb[3].mxu0 }
 0x10d   :  { %240 = vst [vmem:[#allocation5 + $0x10] sm:$0xff] %v232_v48  ;;  %239 = vst [vmem:[#allocation5 + $0x8] sm:$0xff] %v193_v49  ;;  %v236_v55 = vpop.f32.mrb[3].mxu1 }
 0x10e   :  { %241 = vst [vmem:[#allocation5 + $0x18] sm:$0xff] %v234_v52 }
 0x10f   :  { %316 = shalt.err (!%p313_p12)
}
 0x110   :  { %s317_s5 = scalar_lea.hbm %s434_s3, 512 }
 0x111   :  { %p318_p13 = scmp.ne.s32.totalorder %s434_s3, %s317_s5  ;;  %p321_p0 = scmp.lt.u32.totalorder %s317_s5, %s434_s3 }
 0x113   :  { %p323_p1 = pnand %p321_p0, %p318_p13 }
 0x115   :  { %326 = shalt.err (!%p323_p1)
}
 0x116   :  { %251 = dma.vmem_to_hbm [thread:$0]  %s249_s29, 512, %s434_s3, [#allocation4]  }
 0x117   :  { %329 = dma.done.wait [#allocation4], 512  }
 0x118   :  { %330 = vsyncadd [#allocation4], 4294966784 }
 0x119   :  { %255 = vsyncpa [#allocation3], 1 }
 0x11a   :  { %256 = vsyncpa [#allocation4], 1 }

</bundles_post_ra>
